<compile_context>
chip_gen: v5e
topology: v5e:2x2
jax: 0.10.0
libtpu: 0.0.40
codegen_flags: <defaults>
</compile_context>

<pallas_src>
import functools

import jax
import jax.numpy as jnp
from jax.experimental import pallas as pl
from jax.experimental.pallas import tpu as pltpu

DROPOUT_RATES = (0.1, 0.2, 0.3, 0.4, 0.5)
NUM_CLASSES = 3
IGNORE_INDEX = -100
LANES = 128  # lane-dense output width


def _round_up(n, m):
    return ((n + m - 1) // m) * m


def _head_kernel(*refs, num_classes, ignore_index, training):
    """One tile: (optional dropout-scale) -> single matmul -> logits/CE packed
    into a lane-dense (tile_m, 128) output block."""
    if training:
        x_ref, scale_ref, w_ref, b_ref, lab_ref, out_ref = refs
    else:
        x_ref, w_ref, b_ref, lab_ref, out_ref = refs

    x = x_ref[...]                                   # (TM, H), native dtype
    if training:
        # scale = mean_i(keep_i / (1 - p_i)), precomputed in the wrapper.
        x = x * scale_ref[...].astype(x.dtype)
    w = w_ref[...].astype(x.dtype)                   # (H, 128), zero-padded past C

    # Single fused matmul; logits live in lanes [0, C), zeros elsewhere.
    packed = jnp.dot(x, w, preferred_element_type=jnp.float32)
    packed = packed + b_ref[...].astype(jnp.float32)  # (1, 128) bias, zero-padded

    tm, lanes = packed.shape
    lane = jax.lax.broadcasted_iota(jnp.int32, (tm, lanes), 1)
    is_cls = lane < num_classes

    # Per-token cross entropy computed on the full-width vreg with lane masking
    # (identical vreg cost to a (TM, 3) tensor).
    z = jnp.where(is_cls, packed, -1e30)
    m = jnp.max(z, axis=-1, keepdims=True)
    lse = m + jnp.log(jnp.sum(jnp.exp(z - m), axis=-1, keepdims=True))

    lab = lab_ref[...]                               # (TM, 1) int32
    picked = jnp.sum(jnp.where(lane == lab, packed, 0.0), axis=-1, keepdims=True)
    valid = lab != ignore_index                      # (TM, 1) bool
    loss_tok = jnp.where(valid, lse - picked, 0.0)   # (TM, 1)

    # Pack: lanes [0,C) logits, lane C loss, lane C+1 valid flag, rest zeros.
    out = jnp.where(lane == num_classes, loss_tok, packed)
    out = jnp.where(lane == num_classes + 1, valid.astype(jnp.float32), out)
    out_ref[...] = out


def _dropout_scale(key, shape, rates):
    """Combined inverted-dropout scale: mean_i(keep_i / (1 - p_i)), independent
    Bernoulli mask per branch (matches the PyTorch StableDropout ensemble)."""
    keys = jax.random.split(key, len(rates))
    s = jnp.zeros(shape, jnp.float32)
    for k, p in zip(keys, rates):
        keep = jax.random.bernoulli(k, 1.0 - p, shape)
        s = s + keep.astype(jnp.float32) * (1.0 / (1.0 - p))
    return s * (1.0 / len(rates))


def model5_head(sequence_output, w, b, labels, *, training=False,
                dropout_key=None, tile_m=None):
    """sequence_output: [B, S, H] (any float dtype), w: [H, 3], b: [3],
    labels: [B, S] int (with -100 = ignore)."""
    B, S, H = sequence_output.shape
    C = w.shape[-1]
    M = B * S

    x = sequence_output.reshape(M, H)                 # keep native dtype
    lab = labels.reshape(M).astype(jnp.int32)

    if tile_m is None:
        tile_m = min(512, _round_up(M, 8))            # pipeline-friendly default
    M_pad = _round_up(M, tile_m)
    if M_pad != M:
        x = jnp.pad(x, ((0, M_pad - M), (0, 0)))
        lab = jnp.pad(lab, (0, M_pad - M), constant_values=IGNORE_INDEX)
    lab = lab.reshape(M_pad, 1)

    # Zero-pad the classifier to 128 output lanes (free on the MXU, lane-dense out).
    w_p = jnp.pad(w, ((0, 0), (0, LANES - C)))
    b_p = jnp.pad(b.reshape(1, C), ((0, 0), (0, LANES - C)))

    inputs = [x]
    in_specs = [pl.BlockSpec((tile_m, H), lambda i: (i, 0))]
    if training:
        if dropout_key is None:
            dropout_key = jax.random.PRNGKey(0)
        # TODO(synk): dropout masks are drawn host-side with jax.random because the
        # TPU stateful PRNG (pltpu.prng_seed/prng_random_bits) has no interpret-mode
        # lowering in this environment.
        scale = _dropout_scale(dropout_key, (M_pad, H), DROPOUT_RATES).astype(x.dtype)
        inputs.append(scale)
        in_specs.append(pl.BlockSpec((tile_m, H), lambda i: (i, 0)))
    inputs += [w_p, b_p, lab]
    in_specs += [
        pl.BlockSpec((H, LANES), lambda i: (0, 0)),
        pl.BlockSpec((1, LANES), lambda i: (0, 0)),
        pl.BlockSpec((tile_m, 1), lambda i: (i, 0)),
    ]
    out_spec = pl.BlockSpec((tile_m, LANES), lambda i: (i, 0))

    # Rough VMEM budget: double-buffered inputs + output + resident weights.
    isz = jnp.dtype(x.dtype).itemsize
    est = 2 * tile_m * H * isz
    if training:
        est += 2 * tile_m * H * isz
    est += 2 * tile_m * LANES * 4
    est += (H * LANES + LANES) * jnp.dtype(w_p.dtype).itemsize + 2 * tile_m * 4
    vmem_limit = int(min(100 << 20, max(est + est // 2 + (2 << 20), 16 << 20)))

    kernel = functools.partial(_head_kernel, num_classes=C,
                               ignore_index=IGNORE_INDEX, training=training)

    out = pl.pallas_call(
        kernel,
        out_shape=jax.ShapeDtypeStruct((M_pad, LANES), jnp.float32),
        grid=(M_pad // tile_m,),
        in_specs=in_specs,
        out_specs=out_spec,
        compiler_params=pltpu.CompilerParams(
            dimension_semantics=("parallel",),
            vmem_limit_bytes=vmem_limit,
        ),
    )(*inputs)

    logits = out[:M, :C].reshape(B, S, C)
    loss_sum = out[:M, C].sum()
    valid_cnt = out[:M, C + 1].sum()
    loss = loss_sum / jnp.maximum(valid_cnt, 1.0)     # CE 'mean' over non-ignored tokens
    return logits, loss


def stub_backbone(input_ids, attention_mask, emb_table):
    # TODO(synk): the pretrained AutoModel transformer backbone has no in-script
    # equivalent; this deterministic embedding lookup stands in for outputs[0].
    seq = emb_table[input_ids]                        # [B, S, H]
    return seq * attention_mask[..., None].astype(seq.dtype)


if __name__ == "__main__":
    key = jax.random.PRNGKey(0)
    B, S, H, V = 2, 8, 32, 100

    k_emb, k_w, k_b, k_ids, k_lab, k_drop = jax.random.split(key, 6)
    emb_table = jax.random.normal(k_emb, (V, H), jnp.float32) * 0.1
    w = jax.random.normal(k_w, (H, NUM_CLASSES), jnp.float32) * 0.05   # classifier weight
    b = jax.random.normal(k_b, (NUM_CLASSES,), jnp.float32) * 0.01     # classifier bias

    input_ids = jax.random.randint(k_ids, (B, S), 0, V, jnp.int32)
    attention_mask = jnp.ones((B, S), jnp.int32)
    labels = jax.random.randint(k_lab, (B, S), 0, NUM_CLASSES, jnp.int32)

    sequence_output = stub_backbone(input_ids, attention_mask, emb_table)

    # eval-mode forward (all StableDropouts are identity -> deterministic)
    logits, loss = model5_head(sequence_output, w, b, labels, training=False)
    jax.block_until_ready((logits, loss))

    # pure-JAX reference (eval mode)
    ref_logits = sequence_output.reshape(-1, H) @ w + b
    ref_lse = jax.nn.logsumexp(ref_logits, axis=-1)
    ref_pick = jnp.take_along_axis(ref_logits, labels.reshape(-1, 1), axis=-1)[:, 0]
    ref_loss = jnp.mean(ref_lse - ref_pick)
    assert jnp.allclose(logits.reshape(-1, NUM_CLASSES), ref_logits, atol=1e-5), "logits mismatch"
    assert jnp.allclose(loss, ref_loss, atol=1e-5), "loss mismatch"

    # training path: 5 independent dropout masks fused into one scale tensor
    logits_tr, loss_tr = model5_head(sequence_output, w, b, labels,
                                     training=True, dropout_key=k_drop)
    jax.block_until_ready((logits_tr, loss_tr))
    assert logits_tr.shape == (B, S, NUM_CLASSES)
    assert bool(jnp.isfinite(loss_tr))

    print("KERNEL_OK")
</pallas_src>

<mosaic_0001>
module attributes {stable_mosaic.version = 11 : i64} {
  func.func @_head_kernel(%arg0: i32, %arg1: memref<16x32xf32, #tpu.memory_space<vmem>>, %arg2: memref<32x128xf32, #tpu.memory_space<vmem>>, %arg3: memref<1x128xf32, #tpu.memory_space<vmem>>, %arg4: memref<16x1xi32, #tpu.memory_space<vmem>>, %arg5: memref<16x128xf32, #tpu.memory_space<vmem>>) attributes {dimension_semantics = [#tpu.dimension_semantics<parallel>], iteration_bounds = array<i64: 1>, scalar_prefetch = 0 : i64, scratch_operands = 0 : i64, tpu.core_type = #tpu.core_type<tc>, window_params = [{transform_indices = @transform_0, window_bounds = array<i64: 16, 32>}, {pipeline_mode = #tpu.pipeline_mode<synchronous>, transform_indices = @transform_1, window_bounds = array<i64: 32, 128>}, {pipeline_mode = #tpu.pipeline_mode<synchronous>, transform_indices = @transform_2, window_bounds = array<i64: 1, 128>}, {transform_indices = @transform_3, window_bounds = array<i64: 16, 1>}, {transform_indices = @transform_4, window_bounds = array<i64: 16, 128>}]} {
    %c0 = arith.constant 0 : index
    %c0_0 = arith.constant 0 : index
    %0 = vector.load %arg1[%c0, %c0_0] : memref<16x32xf32, #tpu.memory_space<vmem>>, vector<16x32xf32>
    %c0_1 = arith.constant 0 : index
    %c0_2 = arith.constant 0 : index
    %1 = vector.load %arg2[%c0_1, %c0_2] : memref<32x128xf32, #tpu.memory_space<vmem>>, vector<32x128xf32>
    %cst = arith.constant dense<0.000000e+00> : vector<16x128xf32>
    %2 = tpu.matmul %0, %1, %cst {dimension_numbers = #tpu.dot_dimension_numbers<[1], [0], [0], [1], [0, 0, 1, 1], [], []>} : vector<16x32xf32>, vector<32x128xf32>, vector<16x128xf32> -> vector<16x128xf32>
    %c0_3 = arith.constant 0 : index
    %c0_4 = arith.constant 0 : index
    %3 = vector.load %arg3[%c0_3, %c0_4] : memref<1x128xf32, #tpu.memory_space<vmem>>, vector<1x128xf32>
    %4 = vector.broadcast %3 : vector<1x128xf32> to vector<16x128xf32>
    %5 = arith.addf %2, %4 : vector<16x128xf32>
    %6 = tpu.iota {dimensions = array<i32: 1>} : vector<16x128xi32>
    %c3_i32 = arith.constant 3 : i32
    %7 = vector.broadcast %c3_i32 : i32 to vector<16x128xi32>
    %8 = arith.cmpi slt, %6, %7 : vector<16x128xi32>
    %cst_5 = arith.constant -1.000000e+30 : f32
    %9 = vector.broadcast %cst_5 : f32 to vector<16x128xf32>
    %10 = arith.select %8, %5, %9 : vector<16x128xi1>, vector<16x128xf32>
    %cst_6 = arith.constant dense<0xFF800000> : vector<16xf32>
    %11 = vector.multi_reduction <maximumf>, %10, %cst_6 [1] : vector<16x128xf32> to vector<16xf32>
    %12 = vector.shape_cast %11 : vector<16xf32> to vector<16x1xf32>
    %13 = vector.broadcast %12 : vector<16x1xf32> to vector<16x128xf32>
    %14 = arith.subf %10, %13 : vector<16x128xf32>
    %15 = math.exp %14 : vector<16x128xf32>
    %cst_7 = arith.constant dense<0.000000e+00> : vector<16xf32>
    %16 = vector.multi_reduction <add>, %15, %cst_7 [1] : vector<16x128xf32> to vector<16xf32>
    %17 = vector.shape_cast %16 : vector<16xf32> to vector<16x1xf32>
    %18 = math.log %17 : vector<16x1xf32>
    %19 = arith.addf %12, %18 : vector<16x1xf32>
    %c0_8 = arith.constant 0 : index
    %c0_9 = arith.constant 0 : index
    %20 = vector.load %arg4[%c0_8, %c0_9] : memref<16x1xi32, #tpu.memory_space<vmem>>, vector<16x1xi32>
    %21 = vector.broadcast %20 : vector<16x1xi32> to vector<16x128xi32>
    %22 = arith.cmpi eq, %6, %21 : vector<16x128xi32>
    %cst_10 = arith.constant 0.000000e+00 : f32
    %23 = vector.broadcast %cst_10 : f32 to vector<16x128xf32>
    %24 = arith.select %22, %5, %23 : vector<16x128xi1>, vector<16x128xf32>
    %cst_11 = arith.constant dense<0.000000e+00> : vector<16xf32>
    %25 = vector.multi_reduction <add>, %24, %cst_11 [1] : vector<16x128xf32> to vector<16xf32>
    %26 = vector.shape_cast %25 : vector<16xf32> to vector<16x1xf32>
    %c-100_i32 = arith.constant -100 : i32
    %27 = vector.broadcast %c-100_i32 : i32 to vector<16x1xi32>
    %28 = arith.cmpi ne, %20, %27 : vector<16x1xi32>
    %29 = arith.subf %19, %26 : vector<16x1xf32>
    %cst_12 = arith.constant 0.000000e+00 : f32
    %30 = vector.broadcast %cst_12 : f32 to vector<16x1xf32>
    %31 = arith.select %28, %29, %30 : vector<16x1xi1>, vector<16x1xf32>
    %c3_i32_13 = arith.constant 3 : i32
    %32 = vector.broadcast %c3_i32_13 : i32 to vector<16x128xi32>
    %33 = arith.cmpi eq, %6, %32 : vector<16x128xi32>
    %34 = vector.shape_cast %31 : vector<16x1xf32> to vector<16x1xf32>
    %35 = vector.broadcast %34 : vector<16x1xf32> to vector<16x128xf32>
    %36 = arith.select %33, %35, %5 : vector<16x128xi1>, vector<16x128xf32>
    %c4_i32 = arith.constant 4 : i32
    %37 = vector.broadcast %c4_i32 : i32 to vector<16x128xi32>
    %38 = arith.cmpi eq, %6, %37 : vector<16x128xi32>
    %39 = arith.extui %28 : vector<16x1xi1> to vector<16x1xi32>
    %40 = arith.sitofp %39 : vector<16x1xi32> to vector<16x1xf32>
    %41 = vector.shape_cast %40 : vector<16x1xf32> to vector<16x1xf32>
    %42 = vector.broadcast %41 : vector<16x1xf32> to vector<16x128xf32>
    %43 = arith.select %38, %42, %36 : vector<16x128xi1>, vector<16x128xf32>
    %c0_14 = arith.constant 0 : index
    %c0_15 = arith.constant 0 : index
    %44 = vector.load %arg5[%c0_14, %c0_15] : memref<16x128xf32, #tpu.memory_space<vmem>>, vector<16x128xf32>
    tpu.vector_store %arg5[%c0_14, %c0_15], %43 {strides = array<i32>} : memref<16x128xf32, #tpu.memory_space<vmem>>, vector<16x128xf32>,
    return
  }
  func.func @transform_0(%arg0: i32) -> (i32, i32) {
    %c0_i32 = arith.constant 0 : i32
    %c0_i32_0 = arith.constant 0 : i32
    return %arg0, %c0_i32 : i32, i32
  }
  func.func @transform_1(%arg0: i32) -> (i32, i32) {
    %c0_i32 = arith.constant 0 : i32
    %c0_i32_0 = arith.constant 0 : i32
    %c0_i32_1 = arith.constant 0 : i32
    return %c0_i32, %c0_i32_0 : i32, i32
  }
  func.func @transform_2(%arg0: i32) -> (i32, i32) {
    %c0_i32 = arith.constant 0 : i32
    %c0_i32_0 = arith.constant 0 : i32
    %c0_i32_1 = arith.constant 0 : i32
    return %c0_i32, %c0_i32_0 : i32, i32
  }
  func.func @transform_3(%arg0: i32) -> (i32, i32) {
    %c0_i32 = arith.constant 0 : i32
    %c0_i32_0 = arith.constant 0 : i32
    return %arg0, %c0_i32 : i32, i32
  }
  func.func @transform_4(%arg0: i32) -> (i32, i32) {
    %c0_i32 = arith.constant 0 : i32
    %c0_i32_0 = arith.constant 0 : i32
    return %arg0, %c0_i32 : i32, i32
  }
}

</mosaic_0001>

<bundles_post_ra>
// kernel: tpu_custom_call.1
= control target key start
LH: loop header
LB: loop body
LE: loop exit
PB: predicated region body
PF: predicated region fallthrough
CT: control target
= control target key end

     0   :  { %9 = vsyncpa [#allocation3], 0  ;;  %s324_s0 = inlined_call_operand.vmem [shape: f32[16,32], index: 0, kind: input, shape index: {}]   ;;  %s325_s1 = inlined_call_operand.hbm [shape: f32[32,128], index: 1, kind: input, shape index: {}]   ;;  %s326_s2 = inlined_call_operand.vmem [shape: f32[1,128], index: 2, kind: input, shape index: {}]   ;;  %s327_s3 = inlined_call_operand.vmem [shape: s32[16,1], index: 3, kind: input, shape index: {}]   ;;  %s328_s4 = inlined_call_operand.hbm [shape: f32[16,128], index: 4, kind: output, shape index: {}]  }
   0x1   :  { %10 = vsyncpa [#allocation4], 0  ;;  %s17_s17 = sshll.u32 %s325_s1, 4  ;;  %s255_s18 = smov [#allocation2]   ;;  %s18_s17 = int_to_ptr.hbm [resolvable:$true] %s17_s17 }
   0x2   :  { %s19_s19 = sshll.u32 %s255_s18, 4  ;;  %s256_s20 = smov 128   ;;  %s20_s19 = int_to_ptr.vmem [resolvable:$true] %s19_s19 }
   0x3   :  { %s257_s21 = smov 8  }
   0x4   :  { %25 = dma.hbm_to_vmem [thread:$0]  %s18_s17, 512, %s20_s19, [#allocation3], %s256_s20, %s256_s20, %s257_s21  }
   0x5   :  { %251 = dma.done.wait [#allocation3], 512  }
   0x6   :  { %252 = vsyncadd [#allocation3], 4294966784  ;;  %v258_v0 = vmov 0   ;;  %v39_v1 = vld [vmem:[#allocation2 + $0x18] sm:$0xff]  ;;  %v38_v2 = vld [vmem:[#allocation2 + $0x10] sm:$0xff]  ;;  %vm44_vm0 = vcmask 261120   ;;  %v74_v10 = vlaneseq }
   0x7   :  { %186 = vset.pattern.permute.xlu1 %v258_v0  ;;  %187 = vset.pattern.permute.xlu2 %v258_v0  ;;  %v37_v3 = vld [vmem:[#allocation2 + $0x8] sm:$0xff]  ;;  %v295_v4 = vld [vmem:[%s327_s3] sm:$0xff]  ;;  %v259_v39 = vmov 0.0   ;;  %s159_s6 = sshll.u32 %s328_s4, 4  ;;  %s160_s6 = int_to_ptr.hbm [resolvable:$true] %s159_s6 }
   0x8   :  { %188 = vset.pattern.permute.xlu0 %v258_v0  ;;  %63 = vmatpush.msra.mxu0 %v39_v1  ;;  %v36_v5 = vld [vmem:[#allocation2] sm:$0xff]  ;;  %v35_v7 = vld [vmem:[%s324_s0 + $0x8] sm:$0xff]  ;;  %v307_v11 = vand.u32 127, %v74_v10  ;;  %vm115_vm4 = vcmp.ne.s32.totalorder %v295_v4, 4294967196 }
   0x9   :  { %176 = vmatpush.msra.mxu1 %v39_v1  ;;  %102 = vperm.xlu1 %186, %v295_v4   ;;  %v34_v6 = vld [vmem:[%s324_s0] sm:$0xff]  ;;  %v100_v8 = vld [vmem:[%s327_s3 + $0x8] sm:$0xff]  ;;  %v174_v40 = vsel %vm115_vm4, 1.0, %v259_v39  ;;  %s260_s0 = smov [#allocation5]  }
   0xa   :  { %64 = vmatpush.msra.mxu0 %v38_v2  ;;  %v194_v12 = vld [vmem:[%s326_s2] ss:$0 sm:$0xff]  ;;  %vm76_vm1 = vcmp.lt.s32.totalorder %v307_v11, 3  ;;  %vm116_vm5 = vcmp.ne.s32.totalorder %v100_v8, 4294967196  ;;  %vm121_vm6 = vcmp.eq.s32.totalorder %v307_v11, 3  ;;  %vm134_vm7 = vcmp.eq.s32.totalorder %v307_v11, 4 }
   0xb   :  { %177 = vmatpush.msra.mxu1 %v38_v2  ;;  %v175_v42 = vsel %vm116_vm5, 1.0, %v259_v39  ;;  %s157_s2 = sshll.u32 %s260_s0, 4  ;;  %s158_s2 = int_to_ptr.vmem [resolvable:$true] %s157_s2 }
   0xc   :  { %65 = vmatpush.msra.mxu0 %v37_v3  ;;  %v189_v45 = vpack.i.bf16 %v175_v42, %v174_v40 }
   0xd   :  { %178 = vmatpush.msra.mxu1 %v37_v3 }
   0xe   :  { %66 = vmatpush.msra.mxu0 %v36_v5 }
   0xf   :  { %179 = vmatpush.msra.mxu1 %v36_v5  ;;  %172 = vmatmul.msk.f32.vlgmr.msra.gmra.mxu0 %vm44_vm0, %v34_v6 }
  0x10   :  { %173 = vmatmul.msk.f32.vlgmr.msra.gmra.mxu1 %vm44_vm0, %v35_v7 }
  0x11   :  { %105 = vperm.xlu1 %186, %v100_v8  }
  0x7b   :  { %v103_v9 = vpop.permute.xlu1 %102 }
  0x7c   :  { %vm107_vm3 = vcmp.eq.s32.totalorder %v307_v11, %v103_v9 }
  0x83   :  { %v106_v13 = vpop.permute.xlu1 %105 }
  0x84   :  { %vm108_vm2 = vcmp.eq.s32.totalorder %v307_v11, %v106_v13 }
  0x8c   :  { %v68_v14 = vpop.f32.mrf.mxu0 }
  0x8d   :  { %v71_v15 = vpop.f32.mrf.mxu1  ;;  %v69_v16 = vadd.f32 %v194_v12, %v68_v14 }
  0x8e   :  { %v72_v17 = vadd.f32 %v194_v12, %v71_v15 }
  0x8f   :  { %v77_v18 = vsel %vm76_vm1, %v69_v16, -1e+30  ;;  %v109_v21 = vsel %vm107_vm3, %v69_v16, 0.0 }
  0x90   :  { %v110_v19 = vsel %vm108_vm2, %v72_v17, 0.0  ;;  %79 = vmax.xlane.f32.xlu0 %v77_v18  ;;  %v78_v20 = vsel %vm76_vm1, %v72_v17, -1e+30 }
  0x91   :  { %113 = vadd.xlane.f32.xlu1 %v110_v19 }
  0x98   :  { %81 = vmax.xlane.f32.xlu0 %v78_v20 }
  0xa0   :  { %111 = vadd.xlane.f32.xlu0 %v109_v21 }
 0x103   :  { %v80_v22 = vpop.xlane.xlu0 %79 }
 0x104   :  { %v83_v23 = vsub.f32 %v77_v18, %v80_v22  ;;  %v114_v44 = vpop.xlane.xlu1 %113 }
 0x106   :  { %v85_v24 = vmul.f32 1.442695, %v83_v23 }
 0x108   :  { %195 = vpow2.f32 %v85_v24 }
 0x10b   :  { %v82_v25 = vpop.xlane.xlu0 %81 }
 0x10c   :  { %v84_v26 = vsub.f32 %v78_v20, %v82_v25 }
 0x10e   :  { %v196_v27 = vpop.eup %195  ;;  %v87_v28 = vmul.f32 1.442695, %v84_v26 }
 0x10f   :  { %89 = vadd.xlane.f32.xlu2 %v196_v27 }
 0x110   :  { %197 = vpow2.f32 %v87_v28 }
 0x113   :  { %v112_v35 = vpop.xlane.xlu0 %111 }
 0x116   :  { %v198_v29 = vpop.eup %197 }
 0x117   :  { %91 = vadd.xlane.f32.xlu2 %v198_v29 }
 0x182   :  { %v90_v30 = vpop.xlane.xlu2 %89 }
 0x183   :  { %199 = vlog2.f32 %v90_v30 }
 0x189   :  { %v200_v31 = vpop.eup %199 }
 0x18a   :  { %v94_v32 = vmul.f32 0.6931472, %v200_v31  ;;  %v92_v33 = vpop.xlane.xlu2 %91 }
 0x18b   :  { %201 = vlog2.f32 %v92_v33 }
 0x18c   :  { %v97_v34 = vadd.f32 %v94_v32, %v80_v22 }
 0x18e   :  { %v117_v36 = vsub.f32 %v97_v34, %v112_v35 }
 0x190   :  { %v119_v37 = vsel %vm115_vm4, %v117_v36, 0.0 }
 0x191   :  { %v202_v38 = vpop.eup %201  ;;  %124 = vperm.xlu2 %187, %v119_v37  }
 0x192   :  { %v96_v41 = vmul.f32 0.6931472, %v202_v38 }
 0x194   :  { %v98_v43 = vadd.f32 %v96_v41, %v82_v25 }
 0x196   :  { %v118_v46 = vsub.f32 %v98_v43, %v114_v44 }
 0x198   :  { %v120_v47 = vsel %vm116_vm5, %v118_v46, 0.0 }
 0x199   :  { %129 = vperm.xlu0 %188, %v120_v47   ;;  %190 = vperm.xlu2 %187, %v189_v45  }
 0x1eb   :  { %v125_v48 = vpop.permute.xlu2 %124 }
 0x1ec   :  { %v132_v51 = vsel %vm121_vm6, %v125_v48, %v69_v16 }
 0x1f3   :  { %v191_v49 = vpop.permute.xlu2 %190 }
 0x1f4   :  { %v192_v50 = vunpack.i.l.bf16 %v191_v49  ;;  %v193_v53 = vunpack.i.h.bf16 %v191_v49 }
 0x1f6   :  { %v149_v52 = vsel %vm134_vm7, %v192_v50, %v132_v51 }
 0x1f7   :  { %151 = vst [vmem:[#allocation5] sm:$0xff] %v149_v52 }
 0x20b   :  { %v130_v54 = vpop.permute.xlu0 %129 }
 0x20c   :  { %v133_v55 = vsel %vm121_vm6, %v130_v54, %v72_v17 }
 0x20d   :  { %v150_v56 = vsel %vm134_vm7, %v193_v53, %v133_v55 }
 0x20e   :  { %152 = vst [vmem:[#allocation5 + $0x8] sm:$0xff] %v150_v56 }
 0x20f   :  { %165 = dma.vmem_to_hbm [thread:$0]  %s158_s2, 256, %s160_s6, [#allocation4], %s256_s20, %s256_s20, %s257_s21  }
 0x210   :  { %253 = dma.done.wait [#allocation4], 256  }
 0x211   :  { %254 = vsyncadd [#allocation4], 4294967040 }
 0x212   :  { %170 = vsyncpa [#allocation3], 1 }
 0x213   :  { %171 = vsyncpa [#allocation4], 1 }

</bundles_post_ra>
